<compile_context>
chip_gen: v6e
topology: v6e:2x2x1
jax: 0.10.0
libtpu: 0.0.40
codegen_flags: <defaults>
</compile_context>

<pallas_src>
import functools

import jax
import jax.numpy as jnp
from jax.experimental import pallas as pl
from jax.experimental.pallas import tpu as pltpu

_LANE = 128
_TILE_ROUND = 128  # batch-tile granularity: keeps bf16/f32 sublane tiling clean


def _round_up(x, m):
    return ((x + m - 1) // m) * m


def _cdiv(a, b):
    return -(-a // b)


# ----------------------------------------------------------------------------
# Kernel
# ----------------------------------------------------------------------------
def _mlp_kernel(*refs, n_mid, activation):
    # refs layout:
    #   s_ref, w0, b0, [wmid_stack, bmid_stack]   (present iff n_mid > 0),
    #   wo, bo, out_ref
    s_ref = refs[0]
    out_ref = refs[-1]
    w0_ref, b0_ref = refs[1], refs[2]
    if n_mid:
        wmid_ref, bmid_ref = refs[3], refs[4]
        wo_ref, bo_ref = refs[5], refs[6]
    else:
        wo_ref, bo_ref = refs[3], refs[4]

    if activation == "relu":
        act = lambda x: jnp.maximum(x, 0.0)
    else:  # tanh
        act = jnp.tanh

    compute_dtype = w0_ref.dtype  # bf16 MXU path

    # Layer 0 (i_h): bf16 x bf16 -> f32 accumulate; bias + activation in f32.
    h = jnp.dot(s_ref[...], w0_ref[...], preferred_element_type=jnp.float32)
    h = act(h + b0_ref[...])

    # Interior layers (h_h ModuleList), unrolled at trace time; each stacked
    # weight/bias slice is read exactly once from the VMEM-resident stack.
    for l in range(n_mid):
        h = jnp.dot(h.astype(compute_dtype), wmid_ref[l],
                    preferred_element_type=jnp.float32)
        h = act(h + bmid_ref[l])

    # Output layer (h_o): linear only, no activation.
    out = jnp.dot(h.astype(compute_dtype), wo_ref[...],
                  preferred_element_type=jnp.float32)
    out = out + bo_ref[...]

    # Store only the real n_out lanes (compact output: no padded writeback).
    n_out = out_ref.shape[-1]
    out_ref[...] = out[:, :n_out].astype(out_ref.dtype)


# ----------------------------------------------------------------------------
# Parameter preparation (run once per model, hoisted out of the forward call)
# ----------------------------------------------------------------------------
def prepare_params(weights, biases, compute_dtype=jnp.bfloat16):
    """Pad feature dims to 128 lanes, cast weights to bf16, stack interior
    layers.  Padded lanes stay exactly zero in the forward pass because
    relu(0)=tanh(0)=0 and padded weight rows / biases are zero."""
    assert len(weights) == len(biases) and len(weights) >= 2
    n_dim = int(weights[0].shape[0])
    width = int(weights[0].shape[1])
    n_out = int(weights[-1].shape[1])
    pad_width = _round_up(max(width, _LANE), _LANE)
    pad_out = _round_up(max(n_out, _LANE), _LANE)

    def pad2(a, rows, cols, dtype):
        a = jnp.asarray(a, jnp.float32)
        a = jnp.pad(a, ((0, rows - a.shape[0]), (0, cols - a.shape[1])))
        return a.astype(dtype)

    w0 = pad2(weights[0], n_dim, pad_width, compute_dtype)
    b0 = pad2(jnp.reshape(biases[0], (1, -1)), 1, pad_width, jnp.float32)

    mid_w = [pad2(w, pad_width, pad_width, compute_dtype) for w in weights[1:-1]]
    mid_b = [pad2(jnp.reshape(b, (1, -1)), 1, pad_width, jnp.float32)
             for b in biases[1:-1]]
    n_mid = len(mid_w)
    wmid = jnp.stack(mid_w) if n_mid else None   # (n_mid, pad_width, pad_width)
    bmid = jnp.stack(mid_b) if n_mid else None   # (n_mid, 1, pad_width)

    wo = pad2(weights[-1], pad_width, pad_out, compute_dtype)
    bo = pad2(jnp.reshape(biases[-1], (1, -1)), 1, pad_out, jnp.float32)

    return dict(w0=w0, b0=b0, wmid=wmid, bmid=bmid, wo=wo, bo=bo,
                n_dim=n_dim, n_out=n_out, n_mid=n_mid,
                pad_width=pad_width, pad_out=pad_out,
                compute_dtype=compute_dtype)


# ----------------------------------------------------------------------------
# Forward wrapper
# ----------------------------------------------------------------------------
def net_timestep_forward(S, params, activation="relu", tile_b=2048):
    """Net_Timestep forward as a single batch-tiled Pallas kernel.

    S:      (batch, n_dim) float array.
    params: output of prepare_params().
    """
    batch, n_dim = S.shape
    assert n_dim == params["n_dim"]
    n_out = params["n_out"]
    n_mid = params["n_mid"]
    pad_width = params["pad_width"]
    pad_out = params["pad_out"]
    compute_dtype = params["compute_dtype"]

    # ---- batch tiling -------------------------------------------------------
    # tile_b: multiple of 128, and clamped so that there are >= 2 grid steps
    # whenever the batch allows it (both v7x TensorCores get work).
    tile_b = _round_up(max(int(tile_b), _TILE_ROUND), _TILE_ROUND)
    half = _round_up(_cdiv(batch, 2), _TILE_ROUND)
    tile_b = min(tile_b, half)
    padded_batch = _round_up(batch, tile_b)
    num_tiles = padded_batch // tile_b

    S = S.astype(compute_dtype)
    if padded_batch != batch:
        S = jnp.pad(S, ((0, padded_batch - batch), (0, 0)))

    flat_params = [params["w0"], params["b0"]]
    if n_mid:
        flat_params += [params["wmid"], params["bmid"]]
    flat_params += [params["wo"], params["bo"]]

    # ---- specs --------------------------------------------------------------
    # S / out tiles move with the grid; parameters use constant index_maps so
    # each is DMA'd once and stays VMEM-resident across grid steps.
    in_specs = [pl.BlockSpec((tile_b, n_dim), lambda i: (i, 0))]
    for p in flat_params:
        zeros = (0,) * p.ndim
        in_specs.append(pl.BlockSpec(p.shape, lambda i, z=zeros: z))
    # Compact output block: last dim == full array dim (n_out), so the
    # (8,128) constraint is satisfied without lane padding.
    out_specs = pl.BlockSpec((tile_b, n_out), lambda i: (i, 0))

    # ---- VMEM budget --------------------------------------------------------
    itemsize = jnp.dtype(compute_dtype).itemsize
    s_bytes = 2 * tile_b * _round_up(n_dim, _LANE) * itemsize     # double-buffered S tile
    out_bytes = 2 * tile_b * _LANE * 4                             # double-buffered out tile
    h_bytes = tile_b * pad_width * (4 + itemsize)                  # f32 h + bf16 cast copy
    param_bytes = 2 * sum(int(p.size) * p.dtype.itemsize for p in flat_params)
    vmem_est = s_bytes + out_bytes + h_bytes + param_bytes + (8 << 20)
    try:
        vmem_cap = int(pltpu.get_tpu_info().vmem_capacity_bytes)
    except Exception:
        vmem_cap = 64 << 20  # conservative fallback (v7x-sized)
    vmem_limit = min(max(vmem_est, 16 << 20), (vmem_cap * 3) // 4)

    kernel = functools.partial(_mlp_kernel, n_mid=n_mid, activation=activation)

    out = pl.pallas_call(
        kernel,
        out_shape=jax.ShapeDtypeStruct((padded_batch, n_out), jnp.float32),
        grid=(num_tiles,),
        in_specs=in_specs,
        out_specs=out_specs,
        compiler_params=pltpu.CompilerParams(
            dimension_semantics=("parallel",),
            vmem_limit_bytes=int(vmem_limit),
        ),
    )(S, *flat_params)

    return out[:batch] if padded_batch != batch else out


# ----------------------------------------------------------------------------
# Reference / test scaffolding
# ----------------------------------------------------------------------------
def init_params(key, n_dim, n_out, n_layers, vNetWidth):
    """Deterministic synthetic parameter init (matches module shapes)."""
    dims_in = [n_dim] + [vNetWidth] * (n_layers - 1) + [vNetWidth]
    dims_out = [vNetWidth] * n_layers + [n_out]
    weights, biases = [], []
    for din, dout in zip(dims_in, dims_out):
        key, kw, kb = jax.random.split(key, 3)
        scale = 1.0 / jnp.sqrt(jnp.float32(din))
        weights.append(jax.random.uniform(kw, (din, dout), jnp.float32, -scale, scale))
        biases.append(jax.random.uniform(kb, (dout,), jnp.float32, -scale, scale))
    return weights, biases


def reference_forward(S, weights, biases, activation="relu", compute_dtype=None):
    """Pure-JAX reference.  If compute_dtype is given, matmul inputs are cast
    to it (matching the kernel's bf16-in / f32-accumulate math)."""
    act = (lambda x: jnp.maximum(x, 0.0)) if activation == "relu" else jnp.tanh

    def mm(x, w):
        if compute_dtype is None:
            return jnp.dot(x, w, preferred_element_type=jnp.float32)
        return jnp.dot(x.astype(compute_dtype), w.astype(compute_dtype),
                       preferred_element_type=jnp.float32)

    h = S.astype(jnp.float32)
    for w, b in zip(weights[:-1], biases[:-1]):
        h = act(mm(h, w) + b)
    return mm(h, weights[-1]) + biases[-1]


if __name__ == "__main__":
    # Small shapes consistent with the module; batch chosen so the tile clamp
    # produces 2 grid steps and exercises the ragged-batch padding path.
    n_dim, n_out, n_layers, vNetWidth = 4, 2, 3, 32
    batch = 200

    key = jax.random.PRNGKey(0)
    key, ks = jax.random.split(key)
    S = jax.random.normal(ks, (batch, n_dim), jnp.float32)
    weights, biases = init_params(key, n_dim, n_out, n_layers, vNetWidth)

    params = prepare_params(weights, biases)  # pad/cast once, reused per call

    for activation in ("relu", "tanh"):
        out = net_timestep_forward(S, params, activation=activation)
        out = jax.block_until_ready(out)
        assert out.shape == (batch, n_out)

        # Check against a reference using the same bf16-input / f32-accumulate
        # matmul math (tight tolerance)...
        ref_bf16 = reference_forward(S, weights, biases, activation, jnp.bfloat16)
        assert jnp.allclose(out, ref_bf16, atol=1e-4, rtol=1e-4), \
            f"{activation}: mismatch vs bf16-matched ref"
        # ...and against the pure-f32 reference (loose tol for bf16 rounding).
        ref_f32 = reference_forward(S, weights, biases, activation)
        assert jnp.allclose(out, ref_f32, atol=3e-2, rtol=3e-2), \
            f"{activation}: mismatch vs f32 ref"

    print("KERNEL_OK")
</pallas_src>

<mosaic_0001>
module attributes {stable_mosaic.version = 11 : i64} {
  func.func @_mlp_kernel(%arg0: i32, %arg1: memref<128x4xbf16, #tpu.memory_space<vmem>>, %arg2: memref<4x128xbf16, #tpu.memory_space<vmem>>, %arg3: memref<1x128xf32, #tpu.memory_space<vmem>>, %arg4: memref<2x128x128xbf16, #tpu.memory_space<vmem>>, %arg5: memref<2x1x128xf32, #tpu.memory_space<vmem>>, %arg6: memref<128x128xbf16, #tpu.memory_space<vmem>>, %arg7: memref<1x128xf32, #tpu.memory_space<vmem>>, %arg8: memref<128x2xf32, #tpu.memory_space<vmem>>) attributes {dimension_semantics = [#tpu.dimension_semantics<parallel>], iteration_bounds = array<i64: 2>, scalar_prefetch = 0 : i64, scratch_operands = 0 : i64, tpu.core_type = #tpu.core_type<tc>, window_params = [{transform_indices = @transform_0, window_bounds = array<i64: 128, 4>}, {pipeline_mode = #tpu.pipeline_mode<synchronous>, transform_indices = @transform_1, window_bounds = array<i64: 4, 128>}, {pipeline_mode = #tpu.pipeline_mode<synchronous>, transform_indices = @transform_2, window_bounds = array<i64: 1, 128>}, {pipeline_mode = #tpu.pipeline_mode<synchronous>, transform_indices = @transform_3, window_bounds = array<i64: 2, 128, 128>}, {pipeline_mode = #tpu.pipeline_mode<synchronous>, transform_indices = @transform_4, window_bounds = array<i64: 2, 1, 128>}, {pipeline_mode = #tpu.pipeline_mode<synchronous>, transform_indices = @transform_5, window_bounds = array<i64: 128, 128>}, {pipeline_mode = #tpu.pipeline_mode<synchronous>, transform_indices = @transform_6, window_bounds = array<i64: 1, 128>}, {transform_indices = @transform_7, window_bounds = array<i64: 128, 2>}]} {
    %c0 = arith.constant 0 : index
    %c0_0 = arith.constant 0 : index
    %0 = vector.load %arg1[%c0, %c0_0] : memref<128x4xbf16, #tpu.memory_space<vmem>>, vector<128x4xbf16>
    %c0_1 = arith.constant 0 : index
    %c0_2 = arith.constant 0 : index
    %1 = vector.load %arg2[%c0_1, %c0_2] : memref<4x128xbf16, #tpu.memory_space<vmem>>, vector<4x128xbf16>
    %cst = arith.constant dense<0.000000e+00> : vector<128x128xf32>
    %2 = tpu.matmul %0, %1, %cst {dimension_numbers = #tpu.dot_dimension_numbers<[1], [0], [0], [1], [0, 0, 1, 1], [], []>} : vector<128x4xbf16>, vector<4x128xbf16>, vector<128x128xf32> -> vector<128x128xf32>
    %c0_3 = arith.constant 0 : index
    %c0_4 = arith.constant 0 : index
    %3 = vector.load %arg3[%c0_3, %c0_4] : memref<1x128xf32, #tpu.memory_space<vmem>>, vector<1x128xf32>
    %4 = vector.broadcast %3 : vector<1x128xf32> to vector<128x128xf32>
    %5 = arith.addf %2, %4 : vector<128x128xf32>
    %cst_5 = arith.constant 0.000000e+00 : f32
    %6 = vector.broadcast %cst_5 : f32 to vector<128x128xf32>
    %7 = arith.maximumf %5, %6 : vector<128x128xf32>
    %8 = arith.truncf %7 : vector<128x128xf32> to vector<128x128xbf16>
    %c0_6 = arith.constant 0 : index
    %c0_7 = arith.constant 0 : index
    %c0_8 = arith.constant 0 : index
    %9 = vector.load %arg4[%c0_6, %c0_7, %c0_8] : memref<2x128x128xbf16, #tpu.memory_space<vmem>>, vector<1x128x128xbf16>
    %10 = vector.shape_cast %9 : vector<1x128x128xbf16> to vector<128x128xbf16>
    %cst_9 = arith.constant dense<0.000000e+00> : vector<128x128xf32>
    %11 = tpu.matmul %8, %10, %cst_9 {dimension_numbers = #tpu.dot_dimension_numbers<[1], [0], [0], [1], [0, 0, 1, 1], [], []>} : vector<128x128xbf16>, vector<128x128xbf16>, vector<128x128xf32> -> vector<128x128xf32>
    %c0_10 = arith.constant 0 : index
    %c0_11 = arith.constant 0 : index
    %c0_12 = arith.constant 0 : index
    %12 = vector.load %arg5[%c0_10, %c0_11, %c0_12] : memref<2x1x128xf32, #tpu.memory_space<vmem>>, vector<1x1x128xf32>
    %13 = vector.shape_cast %12 : vector<1x1x128xf32> to vector<1x128xf32>
    %14 = vector.broadcast %13 : vector<1x128xf32> to vector<128x128xf32>
    %15 = arith.addf %11, %14 : vector<128x128xf32>
    %cst_13 = arith.constant 0.000000e+00 : f32
    %16 = vector.broadcast %cst_13 : f32 to vector<128x128xf32>
    %17 = arith.maximumf %15, %16 : vector<128x128xf32>
    %18 = arith.truncf %17 : vector<128x128xf32> to vector<128x128xbf16>
    %c1 = arith.constant 1 : index
    %c0_14 = arith.constant 0 : index
    %c0_15 = arith.constant 0 : index
    %19 = vector.load %arg4[%c1, %c0_14, %c0_15] : memref<2x128x128xbf16, #tpu.memory_space<vmem>>, vector<1x128x128xbf16>
    %20 = vector.shape_cast %19 : vector<1x128x128xbf16> to vector<128x128xbf16>
    %cst_16 = arith.constant dense<0.000000e+00> : vector<128x128xf32>
    %21 = tpu.matmul %18, %20, %cst_16 {dimension_numbers = #tpu.dot_dimension_numbers<[1], [0], [0], [1], [0, 0, 1, 1], [], []>} : vector<128x128xbf16>, vector<128x128xbf16>, vector<128x128xf32> -> vector<128x128xf32>
    %c1_17 = arith.constant 1 : index
    %c0_18 = arith.constant 0 : index
    %c0_19 = arith.constant 0 : index
    %22 = vector.load %arg5[%c1_17, %c0_18, %c0_19] : memref<2x1x128xf32, #tpu.memory_space<vmem>>, vector<1x1x128xf32>
    %23 = vector.shape_cast %22 : vector<1x1x128xf32> to vector<1x128xf32>
    %24 = vector.broadcast %23 : vector<1x128xf32> to vector<128x128xf32>
    %25 = arith.addf %21, %24 : vector<128x128xf32>
    %cst_20 = arith.constant 0.000000e+00 : f32
    %26 = vector.broadcast %cst_20 : f32 to vector<128x128xf32>
    %27 = arith.maximumf %25, %26 : vector<128x128xf32>
    %28 = arith.truncf %27 : vector<128x128xf32> to vector<128x128xbf16>
    %c0_21 = arith.constant 0 : index
    %c0_22 = arith.constant 0 : index
    %29 = vector.load %arg6[%c0_21, %c0_22] : memref<128x128xbf16, #tpu.memory_space<vmem>>, vector<128x128xbf16>
    %cst_23 = arith.constant dense<0.000000e+00> : vector<128x128xf32>
    %30 = tpu.matmul %28, %29, %cst_23 {dimension_numbers = #tpu.dot_dimension_numbers<[1], [0], [0], [1], [0, 0, 1, 1], [], []>} : vector<128x128xbf16>, vector<128x128xbf16>, vector<128x128xf32> -> vector<128x128xf32>
    %c0_24 = arith.constant 0 : index
    %c0_25 = arith.constant 0 : index
    %31 = vector.load %arg7[%c0_24, %c0_25] : memref<1x128xf32, #tpu.memory_space<vmem>>, vector<1x128xf32>
    %32 = vector.broadcast %31 : vector<1x128xf32> to vector<128x128xf32>
    %33 = arith.addf %30, %32 : vector<128x128xf32>
    %34 = vector.extract_strided_slice %33 {offsets = [0, 0], sizes = [128, 2], strides = [1, 1]} : vector<128x128xf32> to vector<128x2xf32>
    %c0_26 = arith.constant 0 : index
    %c0_27 = arith.constant 0 : index
    %35 = vector.load %arg8[%c0_26, %c0_27] : memref<128x2xf32, #tpu.memory_space<vmem>>, vector<128x2xf32>
    tpu.vector_store %arg8[%c0_26, %c0_27], %34 {strides = array<i32>} : memref<128x2xf32, #tpu.memory_space<vmem>>, vector<128x2xf32>,
    return
  }
  func.func @transform_0(%arg0: i32) -> (i32, i32) {
    %c0_i32 = arith.constant 0 : i32
    %c0_i32_0 = arith.constant 0 : i32
    return %arg0, %c0_i32 : i32, i32
  }
  func.func @transform_1(%arg0: i32) -> (i32, i32) {
    %c0_i32 = arith.constant 0 : i32
    %c0_i32_0 = arith.constant 0 : i32
    %c0_i32_1 = arith.constant 0 : i32
    return %c0_i32, %c0_i32_0 : i32, i32
  }
  func.func @transform_2(%arg0: i32) -> (i32, i32) {
    %c0_i32 = arith.constant 0 : i32
    %c0_i32_0 = arith.constant 0 : i32
    %c0_i32_1 = arith.constant 0 : i32
    return %c0_i32, %c0_i32_0 : i32, i32
  }
  func.func @transform_3(%arg0: i32) -> (i32, i32, i32) {
    %c0_i32 = arith.constant 0 : i32
    %c0_i32_0 = arith.constant 0 : i32
    %c0_i32_1 = arith.constant 0 : i32
    %c0_i32_2 = arith.constant 0 : i32
    return %c0_i32, %c0_i32_0, %c0_i32_1 : i32, i32, i32
  }
  func.func @transform_4(%arg0: i32) -> (i32, i32, i32) {
    %c0_i32 = arith.constant 0 : i32
    %c0_i32_0 = arith.constant 0 : i32
    %c0_i32_1 = arith.constant 0 : i32
    %c0_i32_2 = arith.constant 0 : i32
    return %c0_i32, %c0_i32_0, %c0_i32_1 : i32, i32, i32
  }
  func.func @transform_5(%arg0: i32) -> (i32, i32) {
    %c0_i32 = arith.constant 0 : i32
    %c0_i32_0 = arith.constant 0 : i32
    %c0_i32_1 = arith.constant 0 : i32
    return %c0_i32, %c0_i32_0 : i32, i32
  }
  func.func @transform_6(%arg0: i32) -> (i32, i32) {
    %c0_i32 = arith.constant 0 : i32
    %c0_i32_0 = arith.constant 0 : i32
    %c0_i32_1 = arith.constant 0 : i32
    return %c0_i32, %c0_i32_0 : i32, i32
  }
  func.func @transform_7(%arg0: i32) -> (i32, i32) {
    %c0_i32 = arith.constant 0 : i32
    %c0_i32_0 = arith.constant 0 : i32
    return %arg0, %c0_i32 : i32, i32
  }
}

</mosaic_0001>

<bundles_post_ra>
// kernel: tpu_custom_call.1
= control target key start
LH: loop header
LB: loop body
LE: loop exit
PB: predicated region body
PF: predicated region fallthrough
CT: control target
= control target key end

     0   :  { %12 = vsyncpa [#allocation3], 0  ;;  %s1547_s24 = smov 0   ;;  %s1710_s0 = inlined_call_operand.vmem [shape: bf16[256,4], index: 0, kind: input, shape index: {}]   ;;  %s1711_s1 = inlined_call_operand.vmem [shape: bf16[4,128], index: 1, kind: input, shape index: {}]   ;;  %s1712_s2 = inlined_call_operand.vmem [shape: f32[1,128], index: 2, kind: input, shape index: {}]   ;;  %s1713_s3 = inlined_call_operand.vmem [shape: bf16[2,128,128], index: 3, kind: input, shape index: {}]   ;;  %s1714_s4 = inlined_call_operand.vmem [shape: f32[2,1,128], index: 4, kind: input, shape index: {}]   ;;  %s1715_s5 = inlined_call_operand.hbm [shape: bf16[128,128], index: 5, kind: input, shape index: {}]   ;;  %s1716_s6 = inlined_call_operand.vmem [shape: f32[1,128], index: 6, kind: input, shape index: {}]   ;;  %s1717_s7 = inlined_call_operand.vmem [shape: f32[256,2], index: 7, kind: output, shape index: {}]  }
   0x1 LB: > { %s1151_s25 = sadd.s32 4294967295, %s1502_s24   ;;  %p1153_p0 = scmp.ge.s32.totalorder %s1502_s24, 1  ;;  %s1502_s24 = sphi %s1547_s24, %s18_s24  }
   0x2   : > { %p201_p1 = scmp.lt.s32.totalorder %s1502_s24, 3  ;;  %s1504_s26 = smov [#allocation2]  }
   0x3   : > { %s225_s27 = sshll.u32 %s1504_s26, 4  ;;  %p1559_p3 = scmp.eq.s32.totalorder %s1151_s25, 0  ;;  %s226_s27 = int_to_ptr.vmem [resolvable:$true] %s225_s27 }
   0x4   : > { %p1555_p2 = pnand %p1153_p0, %p201_p1  ;;  %s1477_s30 = scalar_lea.vmem %s226_s27, 1024 }
   0x5   : > { %p1478_p7 = scmp.ne.s32.totalorder %s226_s27, %s1477_s30  ;;  %p1485_p10 = scmp.lt.s32.totalorder %s226_s27, %s226_s27 }
   0x6   : > { %p1417_p4 = pneg %p1555_p2  ;;  %p1486_p11 = scmp.lt.s32.totalorder %s1477_s30, %s1477_s30 }
   0x8   : > { %p1418_p5 = pnand %p1559_p3, %p1417_p4  ;;  %p1487_p12 = por %p1486_p11, %p1485_p10 }
   0xa   : > { %p1468_p6 = pneg %p1418_p5 }
   0xc   : > { %p1480_p8 = pnand %p1478_p7, %p1468_p6 }
   0xe   : > { %p1481_p9 = pneg %p1480_p8 }
  0x10   : > { %p1488_p13 = pnand %p1487_p12, %p1481_p9 }
  0x12   : > { %1491 = shalt.err (!%p1488_p13)
}
  0x13   : > { %s1505_s8 = smov 64   ;;  %s1506_s9 = smov 4  }
  0x14   : > { %1420 = dma.hbm_to_vmem [thread:$0]  (!%p1418_p5), %s1715_s5, 1024, %s226_s27, [#allocation3], %s1505_s8, %s1505_s8, %s1506_s9  }
  0x15   : > { %253 = sbr.rel (%p1555_p2) target bundleno = 879 (0x36f), region = 48 }
  0x1a   : > { %1497 = dma.done.wait (%p1559_p3), [#allocation3], 1024  }
  0x1b   : > { %1499 = vsyncadd (%p1559_p3), [#allocation3], 4294966272  ;;  %s1158_s12 = sshll.u32 %s1151_s25, 4  ;;  %vm387_vm0 = vcmask 1041408   ;;  %vm362_vm1 = vcmask 31744   ;;  %v1442_v7 = vld [vmem:[%s1713_s3 + $0x38] sm:$0xff]  }
  0x1c   : > { %p286_p0 = scmp.lt.s32.totalorder %s1158_s12, 31  ;;  %v314_v0 = vld [vmem:[%s1711_s1] sm:$0x3]  ;;  %v1443_v8 = vld [vmem:[%s1713_s3 + $0x30] sm:$0xff]   ;;  %1300 = vmatprep.subr.bf16.mxu1 %v1442_v7  ;;  %v1444_v9 = vld [vmem:[%s1713_s3 + $0x28] sm:$0xff]   ;;  %vm1066_vm2 = vcmask 15360  }
  0x1d   : > { %1412 = vmatprep.subr.msk.bf16.mxu0 %vm387_vm0, %v314_v0  ;;  %v389_v1 = vsel %vm387_vm0, %v314_v0, 0  ;;  %1301 = vmatpush3.bf16.msra.mxu1 %v1442_v7  ;;  %v1445_v11 = vld [vmem:[%s1713_s3 + $0x20] sm:$0xff]   ;;  %v1446_v13 = vld [vmem:[%s1713_s3 + $0x18] sm:$0xff]   ;;  %v1447_v15 = vld [vmem:[%s1713_s3 + $0x10] sm:$0xff]  }
  0x1e   : > { %s1721_s12 = smov (!%p286_p0, %s1158_s12), 31  ;;  %1283 = vmatpush3.bf16.msra.mxu0 %v389_v1  ;;  %1302 = vmatprep.subr.bf16.mxu1 %v1443_v8  ;;  %v1448_v16 = vld [vmem:[%s1713_s3 + $0x8] sm:$0xff]   ;;  %v1449_v17 = vld [vmem:[%s1713_s3] sm:$0xff]   ;;  %v1450_v18 = vld [vmem:[%s1713_s3 + $0x78] sm:$0xff]  }
  0x1f   : > { %s1159_s13 = sshll.u32 %s1721_s12, 2  ;;  %v1451_v19 = vld [vmem:[%s1713_s3 + $0x70] sm:$0xff]   ;;  %1332 = vmatprep.subr.bf16.mxu0 %v1450_v18  ;;  %v1452_v20 = vld [vmem:[%s1713_s3 + $0x68] sm:$0xff]   ;;  %v1453_v21 = vld [vmem:[%s1713_s3 + $0x60] sm:$0xff]   ;;  %s1161_s15 = sshll.u32 %s1721_s12, 3 }
  0x20   : > { %s1582_s16 = scalar_lea.vmem %s1710_s0, %s1159_s13  ;;  %v1454_v22 = vld [vmem:[%s1713_s3 + $0x58] sm:$0xff]   ;;  %v1162_v25 = vld [vmem:[%s1712_s2] ss:$0 sm:$0xff]  ;;  %s1673_s20 = scalar_lea.vmem %s1717_s7, %s1161_s15 }
  0x21   : > { %v1434_v2 = vld [vmem:[%s1582_s16] sm:$0xff]   ;;  %v1435_v3 = vld [vmem:[%s1582_s16 + $0x8] sm:$0xff]   ;;  %v1436_v4 = vld [vmem:[%s1582_s16 + $0x10] sm:$0xff]   ;;  %1303 = vmatpush3.bf16.msra.mxu1 %v1443_v8 }
  0x22   : > { %1284 = vmatprep.mubr.msk.bf16.mxu0 %vm362_vm1, %v1434_v2  ;;  %v1437_v5 = vld [vmem:[%s1582_s16 + $0x18] sm:$0xff]   ;;  %v1438_v6 = vld [vmem:[%s1582_s16 + $0x20] sm:$0xff]   ;;  %v1439_v10 = vld [vmem:[%s1582_s16 + $0x28] sm:$0xff]   ;;  %1304 = vmatprep.subr.bf16.mxu1 %v1444_v9 }
  0x23   : > { %1285 = vmatmul.mubr.msk.bf16.vlgmr.msra.gmra.mxu0 %vm362_vm1, %v1435_v3  ;;  %v1440_v12 = vld [vmem:[%s1582_s16 + $0x30] sm:$0xff]   ;;  %v1441_v14 = vld [vmem:[%s1582_s16 + $0x38] sm:$0xff]  }
  0x24   : > { %1288 = vmatprep.mubr.msk.bf16.mxu0 %vm362_vm1, %v1436_v4  ;;  %1333 = vmatpush3.bf16.msra.mxu0 %v1450_v18  ;;  %v1457_v18 = vld [vmem:[%s1713_s3 + $0x40] sm:$0xff]  }
  0x25   : > { %1305 = vmatpush3.bf16.msra.mxu1 %v1444_v9  ;;  %1334 = vmatprep.subr.bf16.mxu0 %v1451_v19 }
  0x26   : > { %1306 = vmatprep.subr.bf16.mxu1 %v1445_v11 }
  0x28   : > { %1335 = vmatpush3.bf16.msra.mxu0 %v1451_v19  ;;  %v1458_v19 = vld [vmem:[#allocation2 + $0x38] sm:$0xff]  }
  0x29   : > { %1307 = vmatpush3.bf16.msra.mxu1 %v1445_v11  ;;  %1336 = vmatprep.subr.bf16.mxu0 %v1452_v20 }
  0x2a   : > { %1308 = vmatprep.subr.bf16.mxu1 %v1446_v13 }
  0x2b   : > { %1289 = vmatmul.mubr.msk.bf16.gmra.mxu0 %vm362_vm1, %v1437_v5 }
  0x2c   : > { %1292 = vmatprep.mubr.msk.bf16.mxu0 %vm362_vm1, %v1438_v6  ;;  %1337 = vmatpush3.bf16.msra.mxu0 %v1452_v20  ;;  %v1459_v20 = vld [vmem:[#allocation2 + $0x30] sm:$0xff]  }
  0x2d   : > { %1309 = vmatpush3.bf16.msra.mxu1 %v1446_v13  ;;  %1338 = vmatprep.subr.bf16.mxu0 %v1453_v21 }
  0x2e   : > { %1310 = vmatprep.subr.bf16.mxu1 %v1447_v15 }
  0x30   : > { %1339 = vmatpush3.bf16.msra.mxu0 %v1453_v21  ;;  %v1460_v21 = vld [vmem:[#allocation2 + $0x28] sm:$0xff]  }
  0x31   : > { %1311 = vmatpush3.bf16.msra.mxu1 %v1447_v15  ;;  %1340 = vmatprep.subr.bf16.mxu0 %v1454_v22 }
  0x32   : > { %1312 = vmatprep.subr.bf16.mxu1 %v1448_v16 }
  0x33   : > { %1293 = vmatmul.mubr.msk.bf16.gmra.mxu0 %vm362_vm1, %v1439_v10 }
  0x34   : > { %1296 = vmatprep.mubr.msk.bf16.mxu0 %vm362_vm1, %v1440_v12  ;;  %1341 = vmatpush3.bf16.msra.mxu0 %v1454_v22  ;;  %v1461_v22 = vld [vmem:[#allocation2 + $0x20] sm:$0xff]  }
  0x35   : > { %1313 = vmatpush3.bf16.msra.mxu1 %v1448_v16  ;;  %v1455_v16 = vld [vmem:[%s1713_s3 + $0x50] sm:$0xff]  }
  0x36   : > { %1314 = vmatprep.subr.bf16.mxu1 %v1449_v17  ;;  %1342 = vmatprep.subr.bf16.mxu0 %v1455_v16 }
  0x38   : > { %1343 = vmatpush3.bf16.msra.mxu0 %v1455_v16 }
  0x39   : > { %1315 = vmatpush3.bf16.msra.mxu1 %v1449_v17  ;;  %v1456_v17 = vld [vmem:[%s1713_s3 + $0x48] sm:$0xff]  }
  0x3a   : > { %1344 = vmatprep.subr.bf16.mxu0 %v1456_v17  ;;  %1396 = vmatprep.subr.bf16.mxu1 %v1458_v19 }
  0x3b   : > { %1297 = vmatmul.mubr.msk.bf16.gmra.mxu0 %vm362_vm1, %v1441_v14 }
  0x3c   : > { %1345 = vmatpush3.bf16.msra.mxu0 %v1456_v17  ;;  %v1463_v17 = vld [vmem:[#allocation2 + $0x10] sm:$0xff]  }
  0x3d   : > { %1346 = vmatprep.subr.bf16.mxu0 %v1457_v18 }
  0x40   : > { %1347 = vmatpush3.bf16.msra.mxu0 %v1457_v18  ;;  %v1464_v18 = vld [vmem:[#allocation2 + $0x8] sm:$0xff]  }
  0x41   : > { %1364 = vmatprep.subr.bf16.mxu0 %v1458_v19 }
  0xe3   : > { %v1286_v23 = vpop.f32.mrf.mxu0 }
  0xe4   : > { %v434_v29 = vadd.f32 %v1286_v23, %v1162_v25  ;;  %v1654_v23 = vld [vmem:[#allocation2 + $0x18] sm:$0xff]  }
  0xe5   : > { %v425_v24 = vpop.f32.mrf.mxu0 }
  0xe6   : > { %v426_v27 = vadd.f32 %v1162_v25, %v425_v24  ;;  %v490_v36 = vmax.f32 %v434_v29, 0.0 }
  0xe7   : > { %v1287_v26 = vpop.f32.mrf.mxu0 }
  0xe8   : > { %v437_v28 = vadd.f32 %v1287_v26, %v1162_v25  ;;  %v488_v34 = vmax.f32 %v426_v27, 0.0  ;;  %v1179_v26 = vld [vmem:[%s1714_s4] ss:$0 sm:$0xff] }
  0xe9   : > { %v428_v30 = vpop.f32.mrf.mxu0 }
  0xea   : > { %v429_v31 = vadd.f32 %v1162_v25, %v428_v30  ;;  %v491_v32 = vmax.f32 %v437_v28, 0.0 }
  0xeb   : > { %v1290_v33 = vpop.f32.mrf.mxu0 }
  0xec   : > { %v489_v35 = vmax.f32 %v429_v31, 0.0  ;;  %v505_v39 = vpack.c.bf16 %v491_v32, %v490_v36  ;;  %v450_v43 = vadd.f32 %v1290_v33, %v1162_v25 }
  0xed   : > { %v441_v37 = vpop.f32.mrf.mxu0 }
  0xee   : > { %v504_v38 = vpack.c.bf16 %v489_v35, %v488_v34  ;;  %v442_v41 = vadd.f32 %v1162_v25, %v441_v37  ;;  %v494_v50 = vmax.f32 %v450_v43, 0.0 }
  0xef   : > { %v1291_v40 = vpop.f32.mrf.mxu0 }
  0xf0   : > { %v453_v42 = vadd.f32 %v1291_v40, %v1162_v25  ;;  %1316 = vmatprep.mubr.bf16.mxu1 %v504_v38  ;;  %v492_v48 = vmax.f32 %v442_v41, 0.0 }
  0xf1   : > { %v444_v44 = vpop.f32.mrf.mxu0  ;;  %1317 = vmatmul.mubr.bf16.vlgmr.msra.gmra.mxu1 %v505_v39 }
  0xf2   : > { %v445_v45 = vadd.f32 %v1162_v25, %v444_v44  ;;  %v495_v46 = vmax.f32 %v453_v42, 0.0  ;;  %1404 = vmatpush3.bf16.msra.mxu1 %v1458_v19 }
  0xf3   : > { %v1294_v47 = vpop.f32.mrf.mxu0  ;;  %1397 = vmatprep.subr.bf16.mxu1 %v1459_v20 }
  0xf4   : > { %v493_v49 = vmax.f32 %v445_v45, 0.0  ;;  %v507_v53 = vpack.c.bf16 %v495_v46, %v494_v50  ;;  %v466_v57 = vadd.f32 %v1294_v47, %v1162_v25 }
  0xf5   : > { %v457_v51 = vpop.f32.mrf.mxu0 }
  0xf6   : > { %v506_v52 = vpack.c.bf16 %v493_v49, %v492_v48  ;;  %v458_v55 = vadd.f32 %v1162_v25, %v457_v51  ;;  %v498_v0 = vmax.f32 %v466_v57, 0.0  ;;  %1405 = vmatpush3.bf16.msra.mxu1 %v1459_v20 }
  0xf7   : > { %v1295_v54 = vpop.f32.mrf.mxu0  ;;  %1398 = vmatprep.subr.bf16.mxu1 %v1460_v21 }
  0xf8   : > { %v469_v56 = vadd.f32 %v1295_v54, %v1162_v25  ;;  %1320 = vmatprep.mubr.bf16.mxu1 %v506_v52  ;;  %v496_v62 = vmax.f32 %v458_v55, 0.0 }
  0xf9   : > { %v460_v58 = vpop.f32.mrf.mxu0  ;;  %1321 = vmatmul.mubr.bf16.gmra.mxu1 %v507_v53 }
  0xfa   : > { %v461_v59 = vadd.f32 %v1162_v25, %v460_v58  ;;  %v499_v60 = vmax.f32 %v469_v56, 0.0  ;;  %1406 = vmatpush3.bf16.msra.mxu1 %v1460_v21 }
  0xfb   : > { %v1298_v61 = vpop.f32.mrf.mxu0  ;;  %1399 = vmatprep.subr.bf16.mxu1 %v1461_v22 }
  0xfc   : > { %v497_v63 = vmax.f32 %v461_v59, 0.0  ;;  %v509_v3 = vpack.c.bf16 %v499_v60, %v498_v0  ;;  %v482_v7 = vadd.f32 %v1298_v61, %v1162_v25 }
  0xfd   : > { %v473_v1 = vpop.f32.mrf.mxu0 }
  0xfe   : > { %v508_v2 = vpack.c.bf16 %v497_v63, %v496_v62  ;;  %v474_v5 = vadd.f32 %v1162_v25, %v473_v1  ;;  %v502_v13 = vmax.f32 %v482_v7, 0.0  ;;  %1407 = vmatpush3.bf16.msra.mxu1 %v1461_v22 }
  0xff   : > { %v1299_v4 = vpop.f32.mrf.mxu0  ;;  %1400 = vmatprep.subr.bf16.mxu1 %v1654_v23 }
 0x100   : > { %v485_v6 = vadd.f32 %v1299_v4, %v1162_v25  ;;  %1324 = vmatprep.mubr.bf16.mxu1 %v508_v2  ;;  %v500_v11 = vmax.f32 %v474_v5, 0.0 }
 0x101   : > { %v476_v8 = vpop.f32.mrf.mxu0  ;;  %1325 = vmatmul.mubr.bf16.gmra.mxu1 %v509_v3 }
 0x102   : > { %v477_v9 = vadd.f32 %v1162_v25, %v476_v8  ;;  %v503_v10 = vmax.f32 %v485_v6, 0.0  ;;  %1408 = vmatpush3.bf16.msra.mxu1 %v1654_v23 }
 0x103   : > { %1401 = vmatprep.subr.bf16.mxu1 %v1463_v17 }
 0x104   : > { %v501_v12 = vmax.f32 %v477_v9, 0.0  ;;  %v511_v15 = vpack.c.bf16 %v503_v10, %v502_v13 }
 0x106   : > { %v510_v14 = vpack.c.bf16 %v501_v12, %v500_v11  ;;  %1409 = vmatpush3.bf16.msra.mxu1 %v1463_v17 }
 0x107   : > { %1402 = vmatprep.subr.bf16.mxu1 %v1464_v18 }
 0x108   : > { %1328 = vmatprep.mubr.bf16.mxu1 %v510_v14 }
 0x109   : > { %1329 = vmatmul.mubr.bf16.gmra.mxu1 %v511_v15 }
 0x10a   : > { %1410 = vmatpush3.bf16.msra.mxu1 %v1464_v18 }
 0x1b1   : > { %v1318_v24 = vpop.f32.mrf.mxu1 }
 0x1b2   : > { %v626_v30 = vadd.f32 %v1318_v24, %v1179_v26 }
 0x1b3   : > { %v617_v25 = vpop.f32.mrf.mxu1 }
 0x1b4   : > { %v618_v28 = vadd.f32 %v1179_v26, %v617_v25  ;;  %v682_v37 = vmax.f32 %v626_v30, 0.0 }
 0x1b5   : > { %v1319_v27 = vpop.f32.mrf.mxu1 }
 0x1b6   : > { %v629_v29 = vadd.f32 %v1319_v27, %v1179_v26  ;;  %v680_v35 = vmax.f32 %v618_v28, 0.0 }
 0x1b7   : > { %v620_v31 = vpop.f32.mrf.mxu1 }
 0x1b8   : > { %v621_v32 = vadd.f32 %v1179_v26, %v620_v31  ;;  %v683_v33 = vmax.f32 %v629_v29, 0.0 }
 0x1b9   : > { %v1322_v34 = vpop.f32.mrf.mxu1 }
 0x1ba   : > { %v681_v36 = vmax.f32 %v621_v32, 0.0  ;;  %v697_v40 = vpack.c.bf16 %v683_v33, %v682_v37  ;;  %v642_v44 = vadd.f32 %v1322_v34, %v1179_v26 }
 0x1bb   : > { %v633_v38 = vpop.f32.mrf.mxu1 }
 0x1bc   : > { %v696_v39 = vpack.c.bf16 %v681_v36, %v680_v35  ;;  %v634_v42 = vadd.f32 %v1179_v26, %v633_v38  ;;  %v686_v51 = vmax.f32 %v642_v44, 0.0 }
 0x1bd   : > { %v1323_v41 = vpop.f32.mrf.mxu1 }
 0x1be   : > { %v645_v43 = vadd.f32 %v1323_v41, %v1179_v26  ;;  %1348 = vmatprep.mubr.bf16.mxu0 %v696_v39  ;;  %v684_v49 = vmax.f32 %v634_v42, 0.0 }
 0x1bf   : > { %v636_v45 = vpop.f32.mrf.mxu1  ;;  %1349 = vmatmul.mubr.bf16.vlgmr.msra.gmra.mxu0 %v697_v40 }
 0x1c0   : > { %v637_v46 = vadd.f32 %v1179_v26, %v636_v45  ;;  %1365 = vmatpush3.bf16.msra.mxu0 %v1458_v19  ;;  %v687_v47 = vmax.f32 %v645_v43, 0.0  ;;  %v1465_v19 = vld [vmem:[#allocation2] sm:$0xff]  }
 0x1c1   : > { %v1326_v48 = vpop.f32.mrf.mxu1  ;;  %1366 = vmatprep.subr.bf16.mxu0 %v1459_v20  ;;  %1403 = vmatprep.subr.bf16.mxu1 %v1465_v19 }
 0x1c2   : > { %v685_v50 = vmax.f32 %v637_v46, 0.0  ;;  %v699_v54 = vpack.c.bf16 %v687_v47, %v686_v51  ;;  %v658_v58 = vadd.f32 %v1326_v48, %v1179_v26  ;;  %1411 = vmatpush3.bf16.msra.mxu1 %v1465_v19 }
 0x1c3   : > { %v649_v52 = vpop.f32.mrf.mxu1 }
 0x1c4   : > { %v698_v53 = vpack.c.bf16 %v685_v50, %v684_v49  ;;  %1367 = vmatpush3.bf16.msra.mxu0 %v1459_v20  ;;  %v650_v56 = vadd.f32 %v1179_v26, %v649_v52  ;;  %v690_v1 = vmax.f32 %v658_v58, 0.0 }
 0x1c5   : > { %v1327_v55 = vpop.f32.mrf.mxu1  ;;  %1368 = vmatprep.subr.bf16.mxu0 %v1460_v21 }
 0x1c6   : > { %v661_v57 = vadd.f32 %v1327_v55, %v1179_v26  ;;  %1352 = vmatprep.mubr.bf16.mxu0 %v698_v53  ;;  %v688_v63 = vmax.f32 %v650_v56, 0.0 }
 0x1c7   : > { %v652_v59 = vpop.f32.mrf.mxu1  ;;  %1353 = vmatmul.mubr.bf16.gmra.mxu0 %v699_v54 }
 0x1c8   : > { %v653_v60 = vadd.f32 %v1179_v26, %v652_v59  ;;  %1369 = vmatpush3.bf16.msra.mxu0 %v1460_v21  ;;  %v691_v61 = vmax.f32 %v661_v57, 0.0 }
 0x1c9   : > { %v1330_v62 = vpop.f32.mrf.mxu1  ;;  %1370 = vmatprep.subr.bf16.mxu0 %v1461_v22 }
 0x1ca   : > { %v689_v0 = vmax.f32 %v653_v60, 0.0  ;;  %v701_v4 = vpack.c.bf16 %v691_v61, %v690_v1  ;;  %v674_v8 = vadd.f32 %v1330_v62, %v1179_v26 }
 0x1cb   : > { %v665_v2 = vpop.f32.mrf.mxu1 }
 0x1cc   : > { %v700_v3 = vpack.c.bf16 %v689_v0, %v688_v63  ;;  %1371 = vmatpush3.bf16.msra.mxu0 %v1461_v22  ;;  %v666_v6 = vadd.f32 %v1179_v26, %v665_v2  ;;  %v694_v14 = vmax.f32 %v674_v8, 0.0  ;;  %v1205_v22 = vld [vmem:[%s1714_s4 + $0x1] ss:$0 sm:$0xff] }
 0x1cd   : > { %v1331_v5 = vpop.f32.mrf.mxu1  ;;  %1372 = vmatprep.subr.bf16.mxu0 %v1654_v23 }
 0x1ce   : > { %v677_v7 = vadd.f32 %v1331_v5, %v1179_v26  ;;  %1356 = vmatprep.mubr.bf16.mxu0 %v700_v3  ;;  %v692_v12 = vmax.f32 %v666_v6, 0.0 }
 0x1cf   : > { %v668_v9 = vpop.f32.mrf.mxu1  ;;  %1357 = vmatmul.mubr.bf16.gmra.mxu0 %v701_v4 }
 0x1d0   : > { %v669_v10 = vadd.f32 %v1179_v26, %v668_v9  ;;  %1373 = vmatpush3.bf16.msra.mxu0 %v1654_v23  ;;  %v695_v11 = vmax.f32 %v677_v7, 0.0 }
 0x1d1   : > { %1374 = vmatprep.subr.bf16.mxu0 %v1463_v17 }
 0x1d2   : > { %v693_v13 = vmax.f32 %v669_v10, 0.0  ;;  %v703_v16 = vpack.c.bf16 %v695_v11, %v694_v14 }
 0x1d4   : > { %v702_v15 = vpack.c.bf16 %v693_v13, %v692_v12  ;;  %1375 = vmatpush3.bf16.msra.mxu0 %v1463_v17  ;;  %v1214_v13 = vld [vmem:[%s1716_s6] ss:$0 sm:$0xff] }
 0x1d5   : > { %1376 = vmatprep.subr.bf16.mxu0 %v1464_v18 }
 0x1d6   : > { %1360 = vmatprep.mubr.bf16.mxu0 %v702_v15 }
 0x1d7   : > { %1361 = vmatmul.mubr.bf16.gmra.mxu0 %v703_v16 }
 0x1d8   : > { %1377 = vmatpush3.bf16.msra.mxu0 %v1464_v18 }
 0x1d9   : > { %1378 = vmatprep.subr.bf16.mxu0 %v1465_v19 }
 0x1dc   : > { %1379 = vmatpush3.bf16.msra.mxu0 %v1465_v19 }
 0x27f   : > { %v1350_v20 = vpop.f32.mrf.mxu0 }
 0x280   : > { %v820_v26 = vadd.f32 %v1350_v20, %v1205_v22 }
 0x281   : > { %v811_v21 = vpop.f32.mrf.mxu0 }
 0x282   : > { %v812_v24 = vadd.f32 %v1205_v22, %v811_v21  ;;  %v876_v33 = vmax.f32 %v820_v26, 0.0 }
 0x283   : > { %v1351_v23 = vpop.f32.mrf.mxu0 }
 0x284   : > { %v823_v25 = vadd.f32 %v1351_v23, %v1205_v22  ;;  %v874_v31 = vmax.f32 %v812_v24, 0.0 }
 0x285   : > { %v814_v27 = vpop.f32.mrf.mxu0 }
 0x286   : > { %v815_v28 = vadd.f32 %v1205_v22, %v814_v27  ;;  %v877_v29 = vmax.f32 %v823_v25, 0.0 }
 0x287   : > { %v1354_v30 = vpop.f32.mrf.mxu0 }
 0x288   : > { %v875_v32 = vmax.f32 %v815_v28, 0.0  ;;  %v891_v36 = vpack.c.bf16 %v877_v29, %v876_v33  ;;  %v836_v40 = vadd.f32 %v1354_v30, %v1205_v22 }
 0x289   : > { %v827_v34 = vpop.f32.mrf.mxu0 }
 0x28a   : > { %v890_v35 = vpack.c.bf16 %v875_v32, %v874_v31  ;;  %v828_v38 = vadd.f32 %v1205_v22, %v827_v34  ;;  %v880_v47 = vmax.f32 %v836_v40, 0.0 }
 0x28b   : > { %v1355_v37 = vpop.f32.mrf.mxu0 }
 0x28c   : > { %v839_v39 = vadd.f32 %v1355_v37, %v1205_v22  ;;  %1380 = vmatprep.mubr.bf16.mxu0 %v890_v35  ;;  %v878_v45 = vmax.f32 %v828_v38, 0.0 }
 0x28d   : > { %v830_v41 = vpop.f32.mrf.mxu0  ;;  %1381 = vmatmul.mubr.bf16.vlgmr.msra.gmra.mxu0 %v891_v36 }
 0x28e   : > { %v831_v42 = vadd.f32 %v1205_v22, %v830_v41  ;;  %v881_v43 = vmax.f32 %v839_v39, 0.0 }
 0x28f   : > { %v1358_v44 = vpop.f32.mrf.mxu0 }
 0x290   : > { %v879_v46 = vmax.f32 %v831_v42, 0.0  ;;  %v893_v50 = vpack.c.bf16 %v881_v43, %v880_v47  ;;  %v852_v54 = vadd.f32 %v1358_v44, %v1205_v22 }
 0x291   : > { %v843_v48 = vpop.f32.mrf.mxu0 }
 0x292   : > { %v892_v49 = vpack.c.bf16 %v879_v46, %v878_v45  ;;  %v844_v52 = vadd.f32 %v1205_v22, %v843_v48  ;;  %v884_v61 = vmax.f32 %v852_v54, 0.0 }
 0x293   : > { %v1359_v51 = vpop.f32.mrf.mxu0 }
 0x294   : > { %v855_v53 = vadd.f32 %v1359_v51, %v1205_v22  ;;  %1384 = vmatprep.mubr.bf16.mxu1 %v892_v49  ;;  %v882_v59 = vmax.f32 %v844_v52, 0.0 }
 0x295   : > { %v846_v55 = vpop.f32.mrf.mxu0  ;;  %1385 = vmatmul.mubr.bf16.vlgmr.msra.gmra.mxu1 %v893_v50 }
 0x296   : > { %v847_v56 = vadd.f32 %v1205_v22, %v846_v55  ;;  %v885_v57 = vmax.f32 %v855_v53, 0.0 }
 0x297   : > { %v1362_v58 = vpop.f32.mrf.mxu0 }
 0x298   : > { %v883_v60 = vmax.f32 %v847_v56, 0.0  ;;  %v895_v0 = vpack.c.bf16 %v885_v57, %v884_v61  ;;  %v868_v4 = vadd.f32 %v1362_v58, %v1205_v22 }
 0x299   : > { %v859_v62 = vpop.f32.mrf.mxu0 }
 0x29a   : > { %v894_v63 = vpack.c.bf16 %v883_v60, %v882_v59  ;;  %v860_v2 = vadd.f32 %v1205_v22, %v859_v62  ;;  %v888_v10 = vmax.f32 %v868_v4, 0.0 }
 0x29b   : > { %v1363_v1 = vpop.f32.mrf.mxu0 }
 0x29c   : > { %v871_v3 = vadd.f32 %v1363_v1, %v1205_v22  ;;  %1388 = vmatprep.mubr.bf16.mxu1 %v894_v63  ;;  %v886_v8 = vmax.f32 %v860_v2, 0.0 }
 0x29d   : > { %v862_v5 = vpop.f32.mrf.mxu0  ;;  %1389 = vmatmul.mubr.bf16.gmra.mxu1 %v895_v0 }
 0x29e   : > { %v863_v6 = vadd.f32 %v1205_v22, %v862_v5  ;;  %v889_v7 = vmax.f32 %v871_v3, 0.0 }
 0x2a0   : > { %v887_v9 = vmax.f32 %v863_v6, 0.0  ;;  %v897_v12 = vpack.c.bf16 %v889_v7, %v888_v10 }
 0x2a2   : > { %v896_v11 = vpack.c.bf16 %v887_v9, %v886_v8 }
 0x2a4   : > { %1392 = vmatprep.mubr.bf16.mxu1 %v896_v11 }
 0x2a5   : > { %1393 = vmatmul.mubr.bf16.gmra.mxu1 %v897_v12 }
 0x34d   : > { %v1382_v14 = vpop.f32.mrf.mxu0 }
 0x34e   : > { %v1012_v15 = vadd.f32 %v1382_v14, %v1214_v13 }
 0x34f   : > { %v1003_v16 = vpop.f32.mrf.mxu0 }
 0x350   : > { %1069 = vst.msk [vmem:[%s1673_s20 + $0x10] sm:$0xff] %vm1066_vm2, %v1012_v15  ;;  %v1004_v17 = vadd.f32 %v1214_v13, %v1003_v16 }
 0x351   : > { %v1383_v18 = vpop.f32.mrf.mxu0 }
 0x352   : > { %1067 = vst.msk [vmem:[%s1673_s20] sm:$0xff] %vm1066_vm2, %v1004_v17  ;;  %v1015_v19 = vadd.f32 %v1383_v18, %v1214_v13 }
 0x353   : > { %v1006_v20 = vpop.f32.mrf.mxu0 }
 0x354   : > { %1070 = vst.msk [vmem:[%s1673_s20 + $0x18] sm:$0xff] %vm1066_vm2, %v1015_v19  ;;  %v1007_v21 = vadd.f32 %v1214_v13, %v1006_v20 }
 0x355   : > { %v1386_v22 = vpop.f32.mrf.mxu1 }
 0x356   : > { %1068 = vst.msk [vmem:[%s1673_s20 + $0x8] sm:$0xff] %vm1066_vm2, %v1007_v21  ;;  %v1028_v23 = vadd.f32 %v1386_v22, %v1214_v13 }
 0x357   : > { %v1019_v24 = vpop.f32.mrf.mxu1 }
 0x358   : > { %1073 = vst.msk [vmem:[%s1673_s20 + $0x30] sm:$0xff] %vm1066_vm2, %v1028_v23  ;;  %v1020_v25 = vadd.f32 %v1214_v13, %v1019_v24 }
 0x359   : > { %v1387_v26 = vpop.f32.mrf.mxu1 }
 0x35a   : > { %1071 = vst.msk [vmem:[%s1673_s20 + $0x20] sm:$0xff] %vm1066_vm2, %v1020_v25  ;;  %v1031_v27 = vadd.f32 %v1387_v26, %v1214_v13 }
 0x35b   : > { %v1022_v28 = vpop.f32.mrf.mxu1 }
 0x35c   : > { %1074 = vst.msk [vmem:[%s1673_s20 + $0x38] sm:$0xff] %vm1066_vm2, %v1031_v27  ;;  %v1023_v29 = vadd.f32 %v1214_v13, %v1022_v28 }
 0x35d   : > { %v1390_v30 = vpop.f32.mrf.mxu1 }
 0x35e   : > { %1072 = vst.msk [vmem:[%s1673_s20 + $0x28] sm:$0xff] %vm1066_vm2, %v1023_v29  ;;  %v1044_v31 = vadd.f32 %v1390_v30, %v1214_v13 }
 0x35f   : > { %v1035_v32 = vpop.f32.mrf.mxu1 }
 0x360   : > { %1077 = vst.msk [vmem:[%s1673_s20 + $0x50] sm:$0xff] %vm1066_vm2, %v1044_v31  ;;  %v1036_v33 = vadd.f32 %v1214_v13, %v1035_v32 }
 0x361   : > { %v1391_v34 = vpop.f32.mrf.mxu1 }
 0x362   : > { %1075 = vst.msk [vmem:[%s1673_s20 + $0x40] sm:$0xff] %vm1066_vm2, %v1036_v33  ;;  %v1047_v35 = vadd.f32 %v1391_v34, %v1214_v13 }
 0x363   : > { %v1038_v36 = vpop.f32.mrf.mxu1 }
 0x364   : > { %1078 = vst.msk [vmem:[%s1673_s20 + $0x58] sm:$0xff] %vm1066_vm2, %v1047_v35  ;;  %v1039_v37 = vadd.f32 %v1214_v13, %v1038_v36 }
 0x365   : > { %v1394_v38 = vpop.f32.mrf.mxu1 }
 0x366   : > { %1076 = vst.msk [vmem:[%s1673_s20 + $0x48] sm:$0xff] %vm1066_vm2, %v1039_v37  ;;  %v1060_v39 = vadd.f32 %v1394_v38, %v1214_v13 }
 0x367   : > { %v1051_v40 = vpop.f32.mrf.mxu1 }
 0x368   : > { %1081 = vst.msk [vmem:[%s1673_s20 + $0x70] sm:$0xff] %vm1066_vm2, %v1060_v39  ;;  %v1052_v41 = vadd.f32 %v1214_v13, %v1051_v40 }
 0x369   : > { %v1395_v42 = vpop.f32.mrf.mxu1 }
 0x36a   : > { %1079 = vst.msk [vmem:[%s1673_s20 + $0x60] sm:$0xff] %vm1066_vm2, %v1052_v41  ;;  %v1063_v43 = vadd.f32 %v1395_v42, %v1214_v13 }
 0x36b   : > { %v1054_v44 = vpop.f32.mrf.mxu1 }
 0x36c   : > { %1082 = vst.msk [vmem:[%s1673_s20 + $0x78] sm:$0xff] %vm1066_vm2, %v1063_v43  ;;  %v1055_v45 = vadd.f32 %v1214_v13, %v1054_v44 }
 0x36e   : > { %1080 = vst.msk [vmem:[%s1673_s20 + $0x68] sm:$0xff] %vm1066_vm2, %v1055_v45 }
 0x36f PF: > { %s18_s24 = sadd.s32 1, %s1502_s24  }
 0x370   : > { %p15_p1 = scmp.ge.s32.totalorder %s18_s24, 4  }
 0x372   :  { %17 = sbr.rel (!%p15_p1) target bundleno = 1 (0x1), region = 85 }
 0x377   :  { %1105 = vsyncpa [#allocation3], 1 }
 0x378   :  { %1107 = vsyncpa [#allocation3 + $0x1], 1 }

</bundles_post_ra>
